<compile_context>
chip_gen: v5e
topology: v5e:2x2
jax: 0.10.0
libtpu: 0.0.40
codegen_flags: <defaults>
</compile_context>

<pallas_src>
import jax
import jax.numpy as jnp
from jax import lax
from jax.experimental import pallas as pl
from jax.experimental.pallas import tpu as pltpu

IN_BUF_BYTES = 2 * 1024 * 1024      # ~2 MiB per input tile (double-buffered)
MAX_TILE_B = 32768                  # cap on rows per grid step
PALLAS_MIN_BATCH = 65536            # below this, fused XLA expr wins
DIRECT_ROW_BYTES_MAX = 512          # F*itemsize above this -> pre-slice column


def _single_output_kernel(price_ref, x_ref, o_ref):
    # price_ref: (1, 1) float32 scalar in SMEM
    # x_ref:     (tile_B, Fe) input block in VMEM
    # o_ref:     (tile_B, 1)  output block in VMEM
    price = price_ref[0, 0]                          # hoisted scalar read
    col = x_ref[:, 0:1].astype(jnp.float32)          # (tile_B, 1), f32 (v5e-safe)
    # Keep the "* 0" so NaN/Inf propagation from x[:, 0] matches PyTorch.
    o_ref[...] = (col * jnp.float32(0.0) + price).astype(o_ref.dtype)


def mlp_single_output(x: jax.Array, price: jax.Array, *,
                      force_pallas: bool = False,
                      max_tile_b: int | None = None) -> jax.Array:
    """x: (B, F), price: scalar parameter (shape () or (1,)). Returns (B, 1)."""
    B, F = x.shape
    price = jnp.asarray(price)
    out_dtype = jnp.promote_types(x.dtype, price.dtype)

    # --- small-batch fast path: a single fused XLA elementwise op -----------
    if not force_pallas and B < PALLAS_MIN_BATCH:
        return (x[:, :1] * jnp.zeros((), x.dtype)
                + price.reshape(-1)[0]).astype(out_dtype)

    itemsize = jnp.dtype(x.dtype).itemsize
    if F * itemsize > DIRECT_ROW_BYTES_MAX:
        # Wide rows: one fused slice keeps only column 0 (native dtype kept).
        x_in = lax.slice(x, (0, 0), (B, 1))
    else:
        # Small/medium F: pass x directly; kernel reads column 0 in-place.
        x_in = x
    Fe = x_in.shape[1]

    # Row tile: ~IN_BUF_BYTES per input buffer, multiple of 8 sublanes.
    rows_budget = max(8, (IN_BUF_BYTES // (Fe * itemsize)) // 8 * 8)
    tile_b = min(MAX_TILE_B, rows_budget)
    if max_tile_b is not None:
        tile_b = min(tile_b, max(8, (max_tile_b // 8) * 8))
    if B <= tile_b:
        tile_b = B                       # single full-extent block (any B ok)
    num_blocks = pl.cdiv(B, tile_b)

    # Dual-TC sharding only changes codegen via CORE_PARALLEL (v7x); elsewhere
    # the axis is plain "parallel" (no-op on single-TC v5e/v6e).
    try:
        kind = jax.devices()[0].device_kind.lower()
    except Exception:
        kind = ""
    if num_blocks >= 2 and ("v7" in kind or "7x" in kind):
        dim_sem = (pltpu.CORE_PARALLEL,)
    else:
        dim_sem = ("parallel",)

    in_tile_bytes = tile_b * Fe * itemsize
    out_tile_bytes = tile_b * jnp.dtype(out_dtype).itemsize
    vmem_limit = int(min(32 * 1024 * 1024,
                         max(16 * 1024 * 1024,
                             4 * (in_tile_bytes + out_tile_bytes))))

    price_smem = price.astype(jnp.float32).reshape(1, 1)   # f32 scalar in SMEM

    return pl.pallas_call(
        _single_output_kernel,
        out_shape=jax.ShapeDtypeStruct((B, 1), out_dtype),
        grid_spec=pltpu.PrefetchScalarGridSpec(
            num_scalar_prefetch=0,
            grid=(num_blocks,),
            in_specs=[
                pl.BlockSpec(memory_space=pltpu.MemorySpace.SMEM),   # price
                pl.BlockSpec((tile_b, Fe), lambda i: (i, 0)),        # x rows
            ],
            out_specs=pl.BlockSpec((tile_b, 1), lambda i: (i, 0)),
        ),
        compiler_params=pltpu.CompilerParams(
            dimension_semantics=dim_sem,
            vmem_limit_bytes=vmem_limit,
        ),
    )(price_smem, x_in)


if __name__ == "__main__":
    key = jax.random.PRNGKey(0)

    # --- test 1: small shape, Pallas path forced, incl. NaN propagation -----
    B, F = 8, 32
    x = jax.random.normal(key, (B, F), dtype=jnp.float32)
    x = x.at[0, 0].set(jnp.nan)                      # NaN must propagate
    price = jnp.array([0.0], dtype=jnp.float32)      # same init as the module
    out = jax.block_until_ready(mlp_single_output(x, price, force_pallas=True))
    ref = x[:, 0][:, None] * 0.0 + price
    assert out.shape == (B, 1), out.shape
    assert jnp.allclose(out, ref, equal_nan=True), (out, ref)

    # --- test 2: B not a multiple of 8/128, multi-block partial last tile ---
    B2 = 2053
    x2 = jax.random.normal(jax.random.PRNGKey(1), (B2, F), dtype=jnp.float32)
    price2 = jnp.array([3.25], dtype=jnp.float32)
    out2 = jax.block_until_ready(
        mlp_single_output(x2, price2, force_pallas=True, max_tile_b=512))
    ref2 = x2[:, 0][:, None] * 0.0 + price2
    assert out2.shape == (B2, 1), out2.shape
    assert jnp.allclose(out2, ref2), "multi-block mismatch"

    # --- test 3: wide rows -> fused column-slice path ------------------------
    B3, F3 = 64, 256
    x3 = jax.random.normal(jax.random.PRNGKey(2), (B3, F3), dtype=jnp.float32)
    out3 = jax.block_until_ready(
        mlp_single_output(x3, price2, force_pallas=True))
    ref3 = x3[:, 0][:, None] * 0.0 + price2
    assert out3.shape == (B3, 1) and jnp.allclose(out3, ref3), "wide-F mismatch"

    # --- test 4: auto gate (small B -> fused XLA path) -----------------------
    out4 = jax.block_until_ready(mlp_single_output(x2, price2))
    assert out4.shape == (B2, 1) and jnp.allclose(out4, ref2), "XLA-path mismatch"

    print("KERNEL_OK")
</pallas_src>

<mosaic_0001>
module attributes {stable_mosaic.version = 11 : i64} {
  func.func @_single_output_kernel(%arg0: i32, %arg1: memref<1x1xf32, #tpu.memory_space<smem>>, %arg2: memref<8x32xf32, #tpu.memory_space<vmem>>, %arg3: memref<8x1xf32, #tpu.memory_space<vmem>>) attributes {dimension_semantics = [#tpu.dimension_semantics<parallel>], iteration_bounds = array<i64: 1>, scalar_prefetch = 0 : i64, scratch_operands = 0 : i64, tpu.core_type = #tpu.core_type<tc>, window_params = [{transform_indices = @transform_0, window_bounds = array<i64: 1, 1>}, {transform_indices = @transform_1, window_bounds = array<i64: 8, 32>}, {transform_indices = @transform_2, window_bounds = array<i64: 8, 1>}]} {
    %c0 = arith.constant 0 : index
    %c0_0 = arith.constant 0 : index
    %0 = memref.load %arg1[%c0, %c0_0] : memref<1x1xf32, #tpu.memory_space<smem>>
    %c0_1 = arith.constant 0 : index
    %c0_2 = arith.constant 0 : index
    %1 = vector.load %arg2[%c0_1, %c0_2] : memref<8x32xf32, #tpu.memory_space<vmem>>, vector<8x1xf32>
    %cst = arith.constant 0.000000e+00 : f32
    %2 = vector.broadcast %cst : f32 to vector<8x1xf32>
    %3 = arith.mulf %1, %2 : vector<8x1xf32>
    %4 = vector.broadcast %0 : f32 to vector<8x1xf32>
    %5 = arith.addf %3, %4 : vector<8x1xf32>
    %c0_3 = arith.constant 0 : index
    %c0_4 = arith.constant 0 : index
    %6 = vector.load %arg3[%c0_3, %c0_4] : memref<8x1xf32, #tpu.memory_space<vmem>>, vector<8x1xf32>
    tpu.vector_store %arg3[%c0_3, %c0_4], %5 {strides = array<i32>} : memref<8x1xf32, #tpu.memory_space<vmem>>, vector<8x1xf32>,
    return
  }
  func.func @transform_0(%arg0: i32) -> (i32, i32) {
    %c0_i32 = arith.constant 0 : i32
    %c0_i32_0 = arith.constant 0 : i32
    %c0_i32_1 = arith.constant 0 : i32
    return %c0_i32, %c0_i32_0 : i32, i32
  }
  func.func @transform_1(%arg0: i32) -> (i32, i32) {
    %c0_i32 = arith.constant 0 : i32
    %c0_i32_0 = arith.constant 0 : i32
    return %arg0, %c0_i32 : i32, i32
  }
  func.func @transform_2(%arg0: i32) -> (i32, i32) {
    %c0_i32 = arith.constant 0 : i32
    %c0_i32_0 = arith.constant 0 : i32
    return %arg0, %c0_i32 : i32, i32
  }
}

</mosaic_0001>

<bundles_post_ra>
// kernel: tpu_custom_call.1
= control target key start
LH: loop header
LB: loop body
LE: loop exit
PB: predicated region body
PF: predicated region fallthrough
CT: control target
= control target key end

     0   :  { %8 = vsyncpa [#allocation4], 0  ;;  %s65_s12 = smov [#allocation3]   ;;  %s90_s0 = inlined_call_operand.<no memory space> [shape: f32[1,1], index: 0, kind: input, shape index: {}]   ;;  %s91_s1 = inlined_call_operand.hbm [shape: f32[8,32], index: 1, kind: input, shape index: {}]   ;;  %s92_s2 = inlined_call_operand.vmem [shape: f32[8,1], index: 2, kind: output, shape index: {}]  }
   0x1   :  { %s16_s11 = sshll.u32 %s91_s1, 4  ;;  %s18_s13 = sshll.u32 %s65_s12, 4  ;;  %s17_s11 = int_to_ptr.hbm [resolvable:$true] %s16_s11  ;;  %s19_s13 = int_to_ptr.vmem [resolvable:$true] %s18_s13 }
   0x2   :  { %21 = dma.hbm_to_vmem [thread:$0]  %s17_s11, 128, %s19_s13, [#allocation4]  }
   0x3   :  { %63 = dma.done.wait [#allocation4], 128  }
   0x4   :  { %64 = vsyncadd [#allocation4], 4294967168  ;;  %v27_v0 = vld [vmem:[#allocation3] sm:$0xff]  ;;  %v29_v1 = vstv %s90_s0  ;;  %vm31_vm0 = vcmask 7168  }
   0x5   :  { %v28_v2 = vmul.f32 0.0, %v27_v0 }
   0x7   :  { %v30_v3 = vadd.f32 %v29_v1, %v28_v2 }
   0x9   :  { %32 = vst.msk [vmem:[%s92_s2] sm:$0xff] %vm31_vm0, %v30_v3 }
   0xa   :  { %37 = vsyncpa [#allocation4], 1 }

</bundles_post_ra>
